<compile_context>
chip_gen: v6e
topology: v6e:2x2x1
jax: 0.10.0
libtpu: 0.0.40
codegen_flags: <defaults>
</compile_context>

<pallas_src>
import functools

import numpy as np

import jax
import jax.numpy as jnp
from jax import lax
from jax.experimental import pallas as pl
from jax.experimental.pallas import tpu as pltpu

RELU_SLOPE = 0.1
EPS = 1e-5


def _leaky_relu(x):
    return jnp.where(x > 0, x, RELU_SLOPE * x)


def _shift_down(v):
    """Row i <- v[i-1]; row 0 <- 0 (128-lane-aligned sublane concat)."""
    z = jnp.zeros((1, v.shape[1]), v.dtype)
    return jnp.concatenate([z, v[:-1]], axis=0)


def _shift_up(v):
    """Row i <- v[i+1]; last row <- 0."""
    z = jnp.zeros((1, v.shape[1]), v.dtype)
    return jnp.concatenate([v[1:], z], axis=0)


def _lane_channel_sum(v, cout, width):
    """v: (R, W*Cout) f32 with lane = w*Cout + c.  Returns per-channel totals
    (summed over w) broadcast to every lane via a log2(W) roll butterfly on
    the XLU.  Direction-agnostic because the rolls wrap modulo W*Cout."""
    s = v
    shift = cout
    for _ in range(int(width).bit_length() - 1):   # W is a power of two
        s = s + pltpu.roll(s, shift=shift, axis=1)
        shift *= 2
    return s


# ----------------------------------------------------------------------------
# Kernel: whole block fused, one grid step per batch element.
#   x_ref   : (1, H, W*Cin)        bf16  unpadded input, rows lane-flattened
#   w1e_ref : (W*Cin, 2*W*Cout)    bf16  conv_1 dy=1 band || identity band
#   w1s_ref : (2, W*Cin, W*Cout)   bf16  conv_1 dy=0 / dy=2 bands
#   w2_ref  : (3, W*Cout, W*Cout)  bf16  conv_2 dy=0..2 bands
#   vec_ref : (6, W*Cout)          f32   [b1, bid, b2, gamma, beta, hin_mask]
#   out_ref : (1, H, W*Cout)       bf16  lane-dense output
# ----------------------------------------------------------------------------
def unet_conv_block_kernel(x_ref, w1e_ref, w1s_ref, w2_ref, vec_ref, out_ref,
                           *, cout, width):
    H = out_ref.shape[1]
    WC = out_ref.shape[2]                    # W * Cout
    inv_hw = 1.0 / (H * width)

    b1 = vec_ref[0:1, :]
    bid = vec_ref[1:2, :]
    b2 = vec_ref[2:3, :]
    gamma = vec_ref[3:4, :]
    beta = vec_ref[4:5, :]
    mask = vec_ref[5:6, :]

    x2d = x_ref[0]                           # (H, W*Cin) bf16

    # ---- conv_1 (+ fused identity): 3 per-dy matmuls, shared LHS -----------
    e1 = jnp.dot(x2d, w1e_ref[...], preferred_element_type=jnp.float32)  # (H, 2*WC)
    e0 = jnp.dot(x2d, w1s_ref[0], preferred_element_type=jnp.float32)    # dy=0
    e2 = jnp.dot(x2d, w1s_ref[1], preferred_element_type=jnp.float32)    # dy=2
    acc1 = e1[:, :WC] + _shift_down(e0) + _shift_up(e2) + b1
    idt = e1[:, WC:] + bid

    # ---- Half Instance Norm (first Cout//2 channels), centred two-pass -----
    row_sum = jnp.sum(acc1, axis=0, keepdims=True)                 # (1, WC)
    mean_v = _lane_channel_sum(row_sum, cout, width) * inv_hw
    cen = acc1 - mean_v
    sq_sum = jnp.sum(cen * cen, axis=0, keepdims=True)
    var_v = _lane_channel_sum(sq_sum, cout, width) * inv_hw        # biased var
    inv_std = lax.rsqrt(var_v + EPS)
    normed = cen * inv_std * gamma + beta
    h = _leaky_relu(jnp.where(mask > 0.5, normed, acc1))           # relu_1

    # ---- conv_2: 3 per-dy matmuls, shared LHS; row halo via output shifts --
    hb = h.astype(jnp.bfloat16)
    d0 = jnp.dot(hb, w2_ref[0], preferred_element_type=jnp.float32)
    d1 = jnp.dot(hb, w2_ref[1], preferred_element_type=jnp.float32)
    d2 = jnp.dot(hb, w2_ref[2], preferred_element_type=jnp.float32)
    acc2 = _leaky_relu(d1 + b2 + _shift_down(d0) + _shift_up(d2))  # relu_2

    out_ref[...] = (acc2 + idt).astype(out_ref.dtype).reshape(out_ref.shape)


# ----------------------------------------------------------------------------
# Host-side (one-time) folding of the PyTorch-layout parameters into the
# per-dy banded matrices / channel-tiled vectors the kernel consumes.
# ----------------------------------------------------------------------------
def fold_params(params, H, W):
    w1 = np.asarray(params["w1"], np.float32)       # (Cout, Cin, 3, 3)  OIHW
    w2 = np.asarray(params["w2"], np.float32)       # (Cout, Cout, 3, 3)
    wid = np.asarray(params["wid"], np.float32)     # (Cout, Cin, 1, 1)
    Cout, Cin = w1.shape[0], w1.shape[1]
    half = Cout // 2
    assert W & (W - 1) == 0, "lane roll-reduce assumes W is a power of two"

    w1_hwio = np.transpose(w1, (2, 3, 1, 0))        # (3, 3, Cin, Cout)
    w2_hwio = np.transpose(w2, (2, 3, 1, 0))        # (3, 3, Cout, Cout)
    wid_io = np.transpose(wid[:, :, 0, 0], (1, 0))  # (Cin, Cout)

    def band_dy(w_dy, Ci, Co):
        # (dx, Ci, Co) -> (W*Ci, W*Co); out-of-range taps (width padding) stay 0.
        B = np.zeros((W * Ci, W * Co), np.float32)
        for wo in range(W):
            for dx in range(3):
                wi = wo + dx - 1
                if 0 <= wi < W:
                    B[wi * Ci:(wi + 1) * Ci, wo * Co:(wo + 1) * Co] = w_dy[dx]
        return B

    def band_id(wio, Ci, Co):
        B = np.zeros((W * Ci, W * Co), np.float32)
        for w in range(W):
            B[w * Ci:(w + 1) * Ci, w * Co:(w + 1) * Co] = wio
        return B

    # conv_1 dy=1 band hstacked with the identity 1x1 band -> 2*W*Cout lanes.
    w1e = np.concatenate([band_dy(w1_hwio[1], Cin, Cout),
                          band_id(wid_io, Cin, Cout)], axis=1)
    w1s = np.stack([band_dy(w1_hwio[0], Cin, Cout),
                    band_dy(w1_hwio[2], Cin, Cout)], axis=0)
    w2b = np.stack([band_dy(w2_hwio[dy], Cout, Cout) for dy in range(3)], axis=0)

    def tile_vec(v):
        return np.tile(np.asarray(v, np.float32), W)   # lane = w*Cout + c

    vecs = np.stack([
        tile_vec(params["b1"]),
        tile_vec(params["bid"]),
        tile_vec(params["b2"]),
        tile_vec(np.concatenate([np.asarray(params["gamma"], np.float32),
                                 np.ones(Cout - half, np.float32)])),
        tile_vec(np.concatenate([np.asarray(params["beta"], np.float32),
                                 np.zeros(Cout - half, np.float32)])),
        tile_vec(np.concatenate([np.ones(half, np.float32),
                                 np.zeros(Cout - half, np.float32)])),
    ], axis=0)                                          # (6, W*Cout) f32

    return {
        "w1e": jnp.asarray(w1e, jnp.bfloat16),
        "w1s": jnp.asarray(w1s, jnp.bfloat16),
        "w2b": jnp.asarray(w2b, jnp.bfloat16),
        "vecs": jnp.asarray(vecs),
    }


@jax.jit
def unet_conv_block(x_nchw, folded):
    """x_nchw: (N, Cin, H, W) f32 (PyTorch layout). Returns (N, Cout, H, W) f32."""
    N, Cin, H, W = x_nchw.shape
    WC = folded["vecs"].shape[1]
    Cout = WC // W

    # NCHW -> NHWC -> flatten each row to W*Cin lanes.  No spatial padding:
    # width padding is folded into the bands, row halo is handled in-kernel.
    xrow = jnp.transpose(x_nchw, (0, 2, 3, 1)).reshape(N, H, W * Cin)
    xrow = xrow.astype(jnp.bfloat16)

    kernel = functools.partial(unet_conv_block_kernel, cout=Cout, width=W)

    # Actual banded-matmul FLOPs (2*M*K*N per matmul).
    flops = N * (2 * H * (W * Cin) * (2 * WC)       # conv_1 dy=1 + identity
                 + 2 * (2 * H * (W * Cin) * WC)     # conv_1 dy=0, dy=2
                 + 3 * (2 * H * WC * WC))           # conv_2 dy=0..2
    bytes_accessed = (xrow.size * 2 + folded["w1e"].size * 2
                      + folded["w1s"].size * 2 + folded["w2b"].size * 2
                      + folded["vecs"].size * 4 + N * H * WC * 2)
    cost = pl.CostEstimate(flops=flops, transcendentals=N * WC,
                           bytes_accessed=bytes_accessed)

    grid_spec = pltpu.PrefetchScalarGridSpec(
        num_scalar_prefetch=0,
        grid=(N,),
        in_specs=[
            pl.BlockSpec((1, H, W * Cin), lambda n: (n, 0, 0)),
            pl.BlockSpec(folded["w1e"].shape, lambda n: (0, 0)),
            pl.BlockSpec(folded["w1s"].shape, lambda n: (0, 0, 0)),
            pl.BlockSpec(folded["w2b"].shape, lambda n: (0, 0, 0)),
            pl.BlockSpec(folded["vecs"].shape, lambda n: (0, 0)),
        ],
        out_specs=pl.BlockSpec((1, H, WC), lambda n: (n, 0, 0)),
    )

    out2d = pl.pallas_call(
        kernel,
        out_shape=jax.ShapeDtypeStruct((N, H, WC), jnp.bfloat16),
        grid_spec=grid_spec,
        compiler_params=pltpu.CompilerParams(
            dimension_semantics=("parallel",)),
        cost_estimate=cost,
    )(xrow, folded["w1e"], folded["w1s"], folded["w2b"], folded["vecs"])

    # (N, H, W*Cout) -> (N, H, W, Cout) -> NCHW, upcast after the transpose.
    return out2d.reshape(N, H, W, Cout).transpose(0, 3, 1, 2).astype(jnp.float32)


# ----------------------------------------------------------------------------
# Plain-JAX f32 reference (mirrors the PyTorch module, NCHW / OIHW).
# ----------------------------------------------------------------------------
@jax.jit
def ref_forward(x, p):
    dn = ("NCHW", "OIHW", "NCHW")
    b = lambda v: v[None, :, None, None]
    out = lax.conv_general_dilated(x, p["w1"], (1, 1), "SAME",
                                   dimension_numbers=dn) + b(p["b1"])
    half = out.shape[1] // 2
    o1, o2 = out[:, :half], out[:, half:]
    mean = o1.mean(axis=(2, 3), keepdims=True)
    var = ((o1 - mean) ** 2).mean(axis=(2, 3), keepdims=True)
    o1 = (o1 - mean) / jnp.sqrt(var + EPS) * b(p["gamma"]) + b(p["beta"])
    out = jnp.concatenate([o1, o2], axis=1)
    out = jnp.where(out > 0, out, RELU_SLOPE * out)
    out = lax.conv_general_dilated(out, p["w2"], (1, 1), "SAME",
                                   dimension_numbers=dn) + b(p["b2"])
    out = jnp.where(out > 0, out, RELU_SLOPE * out)
    idt = lax.conv_general_dilated(x, p["wid"], (1, 1), "VALID",
                                   dimension_numbers=dn) + b(p["bid"])
    return out + idt


def init_params(key, in_size, out_size):
    ks = jax.random.split(key, 8)
    s = 0.1
    return {
        "w1": s * jax.random.normal(ks[0], (out_size, in_size, 3, 3), jnp.float32),
        "b1": s * jax.random.normal(ks[1], (out_size,), jnp.float32),
        "w2": s * jax.random.normal(ks[2], (out_size, out_size, 3, 3), jnp.float32),
        "b2": s * jax.random.normal(ks[3], (out_size,), jnp.float32),
        "gamma": 1.0 + s * jax.random.normal(ks[4], (out_size // 2,), jnp.float32),
        "beta": s * jax.random.normal(ks[5], (out_size // 2,), jnp.float32),
        "wid": s * jax.random.normal(ks[6], (out_size, in_size, 1, 1), jnp.float32),
        "bid": s * jax.random.normal(ks[7], (out_size,), jnp.float32),
    }


if __name__ == "__main__":
    key = jax.random.PRNGKey(0)
    N, Cin, Cout, H, W = 2, 4, 8, 16, 16            # PyTorch x: (2, 4, 16, 16) NCHW

    kx, kp = jax.random.split(key)
    x = jax.random.normal(kx, (N, Cin, H, W), jnp.float32)
    params = init_params(kp, Cin, Cout)
    folded = fold_params(params, H, W)

    out = jax.block_until_ready(unet_conv_block(x, folded))
    ref = jax.block_until_ready(ref_forward(x, params))

    assert out.shape == (N, Cout, H, W)
    max_err = float(jnp.max(jnp.abs(out - ref)))
    # bf16 MXU inputs / bf16 output (f32 accumulation & stats) vs f32 reference.
    assert jnp.allclose(out, ref, atol=3e-2, rtol=3e-2), max_err
    print("KERNEL_OK")
</pallas_src>

<mosaic_0001>
module attributes {stable_mosaic.version = 11 : i64} {
  func.func @unet_conv_block_kernel(%arg0: i32, %arg1: memref<1x16x64xbf16, #tpu.memory_space<vmem>>, %arg2: memref<64x256xbf16, #tpu.memory_space<vmem>>, %arg3: memref<2x64x128xbf16, #tpu.memory_space<vmem>>, %arg4: memref<3x128x128xbf16, #tpu.memory_space<vmem>>, %arg5: memref<6x128xf32, #tpu.memory_space<vmem>>, %arg6: memref<1x16x128xbf16, #tpu.memory_space<vmem>>) attributes {dimension_semantics = [#tpu.dimension_semantics<parallel>], iteration_bounds = array<i64: 2>, scalar_prefetch = 0 : i64, scratch_operands = 0 : i64, tpu.core_type = #tpu.core_type<tc>, window_params = [{transform_indices = @transform_0, window_bounds = array<i64: 1, 16, 64>}, {pipeline_mode = #tpu.pipeline_mode<synchronous>, transform_indices = @transform_1, window_bounds = array<i64: 64, 256>}, {pipeline_mode = #tpu.pipeline_mode<synchronous>, transform_indices = @transform_2, window_bounds = array<i64: 2, 64, 128>}, {pipeline_mode = #tpu.pipeline_mode<synchronous>, transform_indices = @transform_3, window_bounds = array<i64: 3, 128, 128>}, {pipeline_mode = #tpu.pipeline_mode<synchronous>, transform_indices = @transform_4, window_bounds = array<i64: 6, 128>}, {transform_indices = @transform_5, window_bounds = array<i64: 1, 16, 128>}]} {
    %c0 = arith.constant 0 : index
    %c0_0 = arith.constant 0 : index
    %0 = vector.load %arg5[%c0, %c0_0] : memref<6x128xf32, #tpu.memory_space<vmem>>, vector<1x128xf32>
    %c1 = arith.constant 1 : index
    %c0_1 = arith.constant 0 : index
    %1 = vector.load %arg5[%c1, %c0_1] : memref<6x128xf32, #tpu.memory_space<vmem>>, vector<1x128xf32>
    %c2 = arith.constant 2 : index
    %c0_2 = arith.constant 0 : index
    %2 = vector.load %arg5[%c2, %c0_2] : memref<6x128xf32, #tpu.memory_space<vmem>>, vector<1x128xf32>
    %c3 = arith.constant 3 : index
    %c0_3 = arith.constant 0 : index
    %3 = vector.load %arg5[%c3, %c0_3] : memref<6x128xf32, #tpu.memory_space<vmem>>, vector<1x128xf32>
    %c4 = arith.constant 4 : index
    %c0_4 = arith.constant 0 : index
    %4 = vector.load %arg5[%c4, %c0_4] : memref<6x128xf32, #tpu.memory_space<vmem>>, vector<1x128xf32>
    %c5 = arith.constant 5 : index
    %c0_5 = arith.constant 0 : index
    %5 = vector.load %arg5[%c5, %c0_5] : memref<6x128xf32, #tpu.memory_space<vmem>>, vector<1x128xf32>
    %c0_6 = arith.constant 0 : index
    %c0_7 = arith.constant 0 : index
    %c0_8 = arith.constant 0 : index
    %6 = vector.load %arg1[%c0_6, %c0_7, %c0_8] : memref<1x16x64xbf16, #tpu.memory_space<vmem>>, vector<1x16x64xbf16>
    %7 = vector.shape_cast %6 : vector<1x16x64xbf16> to vector<16x64xbf16>
    %c0_9 = arith.constant 0 : index
    %c0_10 = arith.constant 0 : index
    %8 = vector.load %arg2[%c0_9, %c0_10] : memref<64x256xbf16, #tpu.memory_space<vmem>>, vector<64x256xbf16>
    %cst = arith.constant dense<0.000000e+00> : vector<16x256xf32>
    %9 = tpu.matmul %7, %8, %cst {dimension_numbers = #tpu.dot_dimension_numbers<[1], [0], [0], [1], [0, 0, 1, 1], [], []>} : vector<16x64xbf16>, vector<64x256xbf16>, vector<16x256xf32> -> vector<16x256xf32>
    %c0_11 = arith.constant 0 : index
    %c0_12 = arith.constant 0 : index
    %c0_13 = arith.constant 0 : index
    %10 = vector.load %arg3[%c0_11, %c0_12, %c0_13] : memref<2x64x128xbf16, #tpu.memory_space<vmem>>, vector<1x64x128xbf16>
    %11 = vector.shape_cast %10 : vector<1x64x128xbf16> to vector<64x128xbf16>
    %cst_14 = arith.constant dense<0.000000e+00> : vector<16x128xf32>
    %12 = tpu.matmul %7, %11, %cst_14 {dimension_numbers = #tpu.dot_dimension_numbers<[1], [0], [0], [1], [0, 0, 1, 1], [], []>} : vector<16x64xbf16>, vector<64x128xbf16>, vector<16x128xf32> -> vector<16x128xf32>
    %c1_15 = arith.constant 1 : index
    %c0_16 = arith.constant 0 : index
    %c0_17 = arith.constant 0 : index
    %13 = vector.load %arg3[%c1_15, %c0_16, %c0_17] : memref<2x64x128xbf16, #tpu.memory_space<vmem>>, vector<1x64x128xbf16>
    %14 = vector.shape_cast %13 : vector<1x64x128xbf16> to vector<64x128xbf16>
    %cst_18 = arith.constant dense<0.000000e+00> : vector<16x128xf32>
    %15 = tpu.matmul %7, %14, %cst_18 {dimension_numbers = #tpu.dot_dimension_numbers<[1], [0], [0], [1], [0, 0, 1, 1], [], []>} : vector<16x64xbf16>, vector<64x128xbf16>, vector<16x128xf32> -> vector<16x128xf32>
    %16 = vector.extract_strided_slice %9 {offsets = [0, 0], sizes = [16, 128], strides = [1, 1]} : vector<16x256xf32> to vector<16x128xf32>
    %cst_19 = arith.constant 0.000000e+00 : f32
    %17 = vector.broadcast %cst_19 : f32 to vector<1x128xf32>
    %18 = vector.extract_strided_slice %12 {offsets = [0, 0], sizes = [15, 128], strides = [1, 1]} : vector<16x128xf32> to vector<15x128xf32>
    %19 = tpu.concatenate %17, %18 in 0 : vector<1x128xf32>, vector<15x128xf32> -> vector<16x128xf32>
    %20 = arith.addf %16, %19 : vector<16x128xf32>
    %cst_20 = arith.constant 0.000000e+00 : f32
    %21 = vector.broadcast %cst_20 : f32 to vector<1x128xf32>
    %22 = vector.extract_strided_slice %15 {offsets = [1, 0], sizes = [15, 128], strides = [1, 1]} : vector<16x128xf32> to vector<15x128xf32>
    %23 = tpu.concatenate %22, %21 in 0 : vector<15x128xf32>, vector<1x128xf32> -> vector<16x128xf32>
    %24 = arith.addf %20, %23 : vector<16x128xf32>
    %25 = vector.broadcast %0 : vector<1x128xf32> to vector<16x128xf32>
    %26 = arith.addf %24, %25 : vector<16x128xf32>
    %27 = vector.extract_strided_slice %9 {offsets = [0, 128], sizes = [16, 128], strides = [1, 1]} : vector<16x256xf32> to vector<16x128xf32>
    %28 = vector.broadcast %1 : vector<1x128xf32> to vector<16x128xf32>
    %29 = arith.addf %27, %28 : vector<16x128xf32>
    %cst_21 = arith.constant dense<0.000000e+00> : vector<128xf32>
    %30 = vector.multi_reduction <add>, %26, %cst_21 [0] : vector<16x128xf32> to vector<128xf32>
    %31 = vector.shape_cast %30 : vector<128xf32> to vector<1x128xf32>
    %c8_i32 = arith.constant 8 : i32
    %32 = tpu.dynamic_rotate %31 by %c8_i32 dim 1 : vector<1x128xf32>, i32 -> vector<1x128xf32>
    %33 = arith.addf %31, %32 : vector<1x128xf32>
    %c16_i32 = arith.constant 16 : i32
    %34 = tpu.dynamic_rotate %33 by %c16_i32 dim 1 : vector<1x128xf32>, i32 -> vector<1x128xf32>
    %35 = arith.addf %33, %34 : vector<1x128xf32>
    %c32_i32 = arith.constant 32 : i32
    %36 = tpu.dynamic_rotate %35 by %c32_i32 dim 1 : vector<1x128xf32>, i32 -> vector<1x128xf32>
    %37 = arith.addf %35, %36 : vector<1x128xf32>
    %c64_i32 = arith.constant 64 : i32
    %38 = tpu.dynamic_rotate %37 by %c64_i32 dim 1 : vector<1x128xf32>, i32 -> vector<1x128xf32>
    %39 = arith.addf %37, %38 : vector<1x128xf32>
    %cst_22 = arith.constant 3.906250e-03 : f32
    %40 = vector.broadcast %cst_22 : f32 to vector<1x128xf32>
    %41 = arith.mulf %39, %40 : vector<1x128xf32>
    %42 = vector.broadcast %41 : vector<1x128xf32> to vector<16x128xf32>
    %43 = arith.subf %26, %42 : vector<16x128xf32>
    %44 = arith.mulf %43, %43 : vector<16x128xf32>
    %cst_23 = arith.constant dense<0.000000e+00> : vector<128xf32>
    %45 = vector.multi_reduction <add>, %44, %cst_23 [0] : vector<16x128xf32> to vector<128xf32>
    %46 = vector.shape_cast %45 : vector<128xf32> to vector<1x128xf32>
    %c8_i32_24 = arith.constant 8 : i32
    %47 = tpu.dynamic_rotate %46 by %c8_i32_24 dim 1 : vector<1x128xf32>, i32 -> vector<1x128xf32>
    %48 = arith.addf %46, %47 : vector<1x128xf32>
    %c16_i32_25 = arith.constant 16 : i32
    %49 = tpu.dynamic_rotate %48 by %c16_i32_25 dim 1 : vector<1x128xf32>, i32 -> vector<1x128xf32>
    %50 = arith.addf %48, %49 : vector<1x128xf32>
    %c32_i32_26 = arith.constant 32 : i32
    %51 = tpu.dynamic_rotate %50 by %c32_i32_26 dim 1 : vector<1x128xf32>, i32 -> vector<1x128xf32>
    %52 = arith.addf %50, %51 : vector<1x128xf32>
    %c64_i32_27 = arith.constant 64 : i32
    %53 = tpu.dynamic_rotate %52 by %c64_i32_27 dim 1 : vector<1x128xf32>, i32 -> vector<1x128xf32>
    %54 = arith.addf %52, %53 : vector<1x128xf32>
    %cst_28 = arith.constant 3.906250e-03 : f32
    %55 = vector.broadcast %cst_28 : f32 to vector<1x128xf32>
    %56 = arith.mulf %54, %55 : vector<1x128xf32>
    %cst_29 = arith.constant 9.99999974E-6 : f32
    %57 = vector.broadcast %cst_29 : f32 to vector<1x128xf32>
    %58 = arith.addf %56, %57 : vector<1x128xf32>
    %59 = math.rsqrt %58 : vector<1x128xf32>
    %60 = vector.broadcast %59 : vector<1x128xf32> to vector<16x128xf32>
    %61 = arith.mulf %43, %60 : vector<16x128xf32>
    %62 = vector.broadcast %3 : vector<1x128xf32> to vector<16x128xf32>
    %63 = arith.mulf %61, %62 : vector<16x128xf32>
    %64 = vector.broadcast %4 : vector<1x128xf32> to vector<16x128xf32>
    %65 = arith.addf %63, %64 : vector<16x128xf32>
    %cst_30 = arith.constant 5.000000e-01 : f32
    %66 = vector.broadcast %cst_30 : f32 to vector<1x128xf32>
    %67 = arith.cmpf ogt, %5, %66 : vector<1x128xf32>
    %68 = vector.shape_cast %67 : vector<1x128xi1> to vector<1x128xi1>
    %69 = vector.broadcast %68 : vector<1x128xi1> to vector<16x128xi1>
    %70 = arith.select %69, %65, %26 : vector<16x128xi1>, vector<16x128xf32>
    %cst_31 = arith.constant 0.000000e+00 : f32
    %71 = vector.broadcast %cst_31 : f32 to vector<16x128xf32>
    %72 = arith.cmpf ogt, %70, %71 : vector<16x128xf32>
    %cst_32 = arith.constant 1.000000e-01 : f32
    %73 = vector.broadcast %cst_32 : f32 to vector<16x128xf32>
    %74 = arith.mulf %73, %70 : vector<16x128xf32>
    %75 = arith.select %72, %70, %74 : vector<16x128xi1>, vector<16x128xf32>
    %76 = arith.truncf %75 : vector<16x128xf32> to vector<16x128xbf16>
    %c0_33 = arith.constant 0 : index
    %c0_34 = arith.constant 0 : index
    %c0_35 = arith.constant 0 : index
    %77 = vector.load %arg4[%c0_33, %c0_34, %c0_35] : memref<3x128x128xbf16, #tpu.memory_space<vmem>>, vector<1x128x128xbf16>
    %78 = vector.shape_cast %77 : vector<1x128x128xbf16> to vector<128x128xbf16>
    %cst_36 = arith.constant dense<0.000000e+00> : vector<16x128xf32>
    %79 = tpu.matmul %76, %78, %cst_36 {dimension_numbers = #tpu.dot_dimension_numbers<[1], [0], [0], [1], [0, 0, 1, 1], [], []>} : vector<16x128xbf16>, vector<128x128xbf16>, vector<16x128xf32> -> vector<16x128xf32>
    %c1_37 = arith.constant 1 : index
    %c0_38 = arith.constant 0 : index
    %c0_39 = arith.constant 0 : index
    %80 = vector.load %arg4[%c1_37, %c0_38, %c0_39] : memref<3x128x128xbf16, #tpu.memory_space<vmem>>, vector<1x128x128xbf16>
    %81 = vector.shape_cast %80 : vector<1x128x128xbf16> to vector<128x128xbf16>
    %cst_40 = arith.constant dense<0.000000e+00> : vector<16x128xf32>
    %82 = tpu.matmul %76, %81, %cst_40 {dimension_numbers = #tpu.dot_dimension_numbers<[1], [0], [0], [1], [0, 0, 1, 1], [], []>} : vector<16x128xbf16>, vector<128x128xbf16>, vector<16x128xf32> -> vector<16x128xf32>
    %c2_41 = arith.constant 2 : index
    %c0_42 = arith.constant 0 : index
    %c0_43 = arith.constant 0 : index
    %83 = vector.load %arg4[%c2_41, %c0_42, %c0_43] : memref<3x128x128xbf16, #tpu.memory_space<vmem>>, vector<1x128x128xbf16>
    %84 = vector.shape_cast %83 : vector<1x128x128xbf16> to vector<128x128xbf16>
    %cst_44 = arith.constant dense<0.000000e+00> : vector<16x128xf32>
    %85 = tpu.matmul %76, %84, %cst_44 {dimension_numbers = #tpu.dot_dimension_numbers<[1], [0], [0], [1], [0, 0, 1, 1], [], []>} : vector<16x128xbf16>, vector<128x128xbf16>, vector<16x128xf32> -> vector<16x128xf32>
    %86 = vector.broadcast %2 : vector<1x128xf32> to vector<16x128xf32>
    %87 = arith.addf %82, %86 : vector<16x128xf32>
    %cst_45 = arith.constant 0.000000e+00 : f32
    %88 = vector.broadcast %cst_45 : f32 to vector<1x128xf32>
    %89 = vector.extract_strided_slice %79 {offsets = [0, 0], sizes = [15, 128], strides = [1, 1]} : vector<16x128xf32> to vector<15x128xf32>
    %90 = tpu.concatenate %88, %89 in 0 : vector<1x128xf32>, vector<15x128xf32> -> vector<16x128xf32>
    %91 = arith.addf %87, %90 : vector<16x128xf32>
    %cst_46 = arith.constant 0.000000e+00 : f32
    %92 = vector.broadcast %cst_46 : f32 to vector<1x128xf32>
    %93 = vector.extract_strided_slice %85 {offsets = [1, 0], sizes = [15, 128], strides = [1, 1]} : vector<16x128xf32> to vector<15x128xf32>
    %94 = tpu.concatenate %93, %92 in 0 : vector<15x128xf32>, vector<1x128xf32> -> vector<16x128xf32>
    %95 = arith.addf %91, %94 : vector<16x128xf32>
    %cst_47 = arith.constant 0.000000e+00 : f32
    %96 = vector.broadcast %cst_47 : f32 to vector<16x128xf32>
    %97 = arith.cmpf ogt, %95, %96 : vector<16x128xf32>
    %cst_48 = arith.constant 1.000000e-01 : f32
    %98 = vector.broadcast %cst_48 : f32 to vector<16x128xf32>
    %99 = arith.mulf %98, %95 : vector<16x128xf32>
    %100 = arith.select %97, %95, %99 : vector<16x128xi1>, vector<16x128xf32>
    %101 = arith.addf %100, %29 : vector<16x128xf32>
    %102 = arith.truncf %101 : vector<16x128xf32> to vector<16x128xbf16>
    %103 = vector.shape_cast %102 : vector<16x128xbf16> to vector<1x16x128xbf16>
    %c0_49 = arith.constant 0 : index
    %c0_50 = arith.constant 0 : index
    %c0_51 = arith.constant 0 : index
    %104 = vector.load %arg6[%c0_49, %c0_50, %c0_51] : memref<1x16x128xbf16, #tpu.memory_space<vmem>>, vector<1x16x128xbf16>
    tpu.vector_store %arg6[%c0_49, %c0_50, %c0_51], %103 {strides = array<i32>} : memref<1x16x128xbf16, #tpu.memory_space<vmem>>, vector<1x16x128xbf16>,
    return
  }
  func.func @transform_0(%arg0: i32) -> (i32, i32, i32) {
    %c0_i32 = arith.constant 0 : i32
    %c0_i32_0 = arith.constant 0 : i32
    %c0_i32_1 = arith.constant 0 : i32
    return %arg0, %c0_i32, %c0_i32_0 : i32, i32, i32
  }
  func.func @transform_1(%arg0: i32) -> (i32, i32) {
    %c0_i32 = arith.constant 0 : i32
    %c0_i32_0 = arith.constant 0 : i32
    %c0_i32_1 = arith.constant 0 : i32
    return %c0_i32, %c0_i32_0 : i32, i32
  }
  func.func @transform_2(%arg0: i32) -> (i32, i32, i32) {
    %c0_i32 = arith.constant 0 : i32
    %c0_i32_0 = arith.constant 0 : i32
    %c0_i32_1 = arith.constant 0 : i32
    %c0_i32_2 = arith.constant 0 : i32
    return %c0_i32, %c0_i32_0, %c0_i32_1 : i32, i32, i32
  }
  func.func @transform_3(%arg0: i32) -> (i32, i32, i32) {
    %c0_i32 = arith.constant 0 : i32
    %c0_i32_0 = arith.constant 0 : i32
    %c0_i32_1 = arith.constant 0 : i32
    %c0_i32_2 = arith.constant 0 : i32
    return %c0_i32, %c0_i32_0, %c0_i32_1 : i32, i32, i32
  }
  func.func @transform_4(%arg0: i32) -> (i32, i32) {
    %c0_i32 = arith.constant 0 : i32
    %c0_i32_0 = arith.constant 0 : i32
    %c0_i32_1 = arith.constant 0 : i32
    return %c0_i32, %c0_i32_0 : i32, i32
  }
  func.func @transform_5(%arg0: i32) -> (i32, i32, i32) {
    %c0_i32 = arith.constant 0 : i32
    %c0_i32_0 = arith.constant 0 : i32
    %c0_i32_1 = arith.constant 0 : i32
    return %arg0, %c0_i32, %c0_i32_0 : i32, i32, i32
  }
}

</mosaic_0001>

<bundles_post_ra>
// kernel: unet_conv_block.1
= control target key start
LH: loop header
LB: loop body
LE: loop exit
PB: predicated region body
PF: predicated region fallthrough
CT: control target
= control target key end

     0   :  { %s1352_s18 = smov 0   ;;  %s1606_s0 = inlined_call_operand.vmem [shape: bf16[2,16,64], index: 0, kind: input, shape index: {}]   ;;  %s1607_s1 = inlined_call_operand.vmem [shape: bf16[64,256], index: 1, kind: input, shape index: {}]   ;;  %s1608_s2 = inlined_call_operand.vmem [shape: bf16[2,64,128], index: 2, kind: input, shape index: {}]   ;;  %s1609_s3 = inlined_call_operand.vmem [shape: bf16[3,128,128], index: 3, kind: input, shape index: {}]   ;;  %s1610_s4 = inlined_call_operand.vmem [shape: f32[6,128], index: 4, kind: input, shape index: {}]   ;;  %s1611_s5 = inlined_call_operand.vmem [shape: bf16[2,16,128], index: 5, kind: output, shape index: {}]  }
   0x1 LB: > { %s1013_s19 = sadd.s32 4294967295, %s1313_s18   ;;  %p1017_p0 = scmp.ge.s32.totalorder %s1313_s18, 1  ;;  %s1313_s18 = sphi %s1352_s18, %s15_s18  }
   0x2   : > { %p187_p1 = scmp.lt.s32.totalorder %s1313_s18, 3 }
   0x4   : > { %p188_p2 = pnand %p1017_p0, %p187_p1 }
   0x5   : > { %p215_p3 = scmp.lt.s32.totalorder (!%p188_p2), %s1013_s19, 1  ;;  %s1318_s11 = smov (!%p188_p2), 8  }
   0x6   : > { %191 = sbr.rel (%p188_p2) target bundleno = 1496 (0x5d8), region = 40  ;;  %s1319_s12 = smov (!%p188_p2), 16  }
   0x7   : > { %s1320_s13 = smov (!%p188_p2), 32   ;;  %s1321_s14 = smov (!%p188_p2), 64  }
   0xb   : > { %v1260_v0 = vld [vmem:[%s1607_s1 + $0x34] ss:$8 sps:$4 sm:$0xff]   ;;  %v1315_v1 = vmov 0.0   ;;  %vm1316_vm0 = vmmov 0   ;;  %v1263_v3 = vld [vmem:[%s1607_s1 + $0x30] ss:$8 sps:$4 sm:$0xff]   ;;  %v535_v59 = vlaneseq }
   0xc   : > { %1161 = vmatprep.subr.bf16.mxu1 %v1315_v1  ;;  %v1262_v2 = vld [vmem:[%s1608_s2 + $0x18] sm:$0xff]   ;;  %1169 = vmatprep.mubr.msk.bf16.mxu1 %vm1316_vm0, %v1315_v1  ;;  %v1317_v4 = vmov 0   ;;  %v1264_v5 = vld [vmem:[%s1607_s1 + $0x24] ss:$8 sps:$4 sm:$0xff]   ;;  %v1266_v6 = vld [vmem:[%s1608_s2 + $0x10] sm:$0xff]   ;;  %s1613_s19 = smov (!%p215_p3, %s1013_s19), 1 }
   0xd   : > { %299 = vmatprep.subr.bf16.mxu0 %v1260_v0  ;;  %323 = vmatprep.mubr.bf16.mxu0 %v1317_v4  ;;  %v1267_v7 = vld [vmem:[%s1607_s1 + $0x20] ss:$8 sps:$4 sm:$0xff]   ;;  %v1268_v8 = vld [vmem:[%s1607_s1 + $0x14] ss:$8 sps:$4 sm:$0xff]   ;;  %s1115_s9 = sshll.u32 %s1613_s19, 3  ;;  %vm287_vm1 = vcmask 523264  }
   0xe   : > { %1162 = vmatpush3.bf16.msra.mxu1 %v1262_v2  ;;  %300 = vmatpush1.bf16.msra.mxu0 %v1263_v3  ;;  %v1270_v9 = vld [vmem:[%s1608_s2 + $0x8] sm:$0xff]   ;;  %v1271_v10 = vld [vmem:[%s1607_s1 + $0x10] ss:$8 sps:$4 sm:$0xff]   ;;  %s219_s16 = scalar_lea.vmem %s1606_s0, %s1115_s9  ;;  %v1274_v12 = vld [vmem:[%s1608_s2] sm:$0xff]   ;;  %vm483_vm2 = vcmask 1040384   ;;  %vm494_vm3 = vcmask 1046528   ;;  %s224_s8 = scalar_lea.vmem %s1611_s5, %s1115_s9 }
   0xf   : > { %1163 = vmatprep.subr.bf16.mxu1 %v1315_v1  ;;  %301 = vmatprep.subr.bf16.mxu0 %v1264_v5  ;;  %v1272_v11 = vld [vmem:[%s1607_s1 + $0x4] ss:$8 sps:$4 sm:$0xff]   ;;  %v1275_v13 = vld [vmem:[%s1607_s1] ss:$8 sps:$4 sm:$0xff]   ;;  %v1277_v15 = vld [vmem:[%s1608_s2 + $0x38] sm:$0xff]   ;;  %v536_v60 = vshrl.u32 %v535_v59, 7 }
  0x10   : > { %v1276_v14 = vld [vmem:[%s219_s16] sm:$0xff]   ;;  %v1278_v16 = vld [vmem:[%s1608_s2 + $0x30] sm:$0xff]   ;;  %v1279_v17 = vld [vmem:[%s1608_s2 + $0x28] sm:$0xff]  }
  0x11   : > { %v1280_v18 = vld [vmem:[%s1608_s2 + $0x20] sm:$0xff]   ;;  %v1458_v62 = vsub.s32 0, %v536_v60 }
  0x12   : > { %1164 = vmatpush3.bf16.msra.mxu1 %v1266_v6  ;;  %302 = vmatpush1.bf16.msra.mxu0 %v1267_v7  ;;  %v1050_v39 = vld [vmem:[%s1610_s4] ss:$0 sm:$0xff] }
  0x13   : > { %1165 = vmatprep.subr.bf16.mxu1 %v1315_v1  ;;  %303 = vmatprep.subr.bf16.mxu0 %v1268_v8 }
  0x16   : > { %1166 = vmatpush3.bf16.msra.mxu1 %v1270_v9  ;;  %304 = vmatpush1.bf16.msra.mxu0 %v1271_v10 }
  0x17   : > { %1167 = vmatprep.subr.bf16.mxu1 %v1315_v1  ;;  %305 = vmatprep.subr.bf16.mxu0 %v1272_v11 }
  0x1a   : > { %1168 = vmatpush3.bf16.msra.mxu1 %v1274_v12  ;;  %306 = vmatpush1.bf16.msra.mxu0 %v1275_v13 }
  0x1b   : > { %1185 = vmatprep.subr.bf16.mxu1 %v1315_v1  ;;  %1173 = vmatprep.subr.bf16.mxu0 %v1315_v1 }
  0x1d   : > { %1170 = vmatmul.mubr.msk.bf16.vlgmr.msra.gmra.mxu1 %vm287_vm1, %v1276_v14  ;;  %1031 = vmatmul.mubr.msk.bf16.vlgmr.msra.gmra.mxu0 %vm287_vm1, %v1276_v14 }
  0x1e   : > { %1201 = vmatprep.mubr.msk.bf16.mxu1 %vm1316_vm0, %v1315_v1  ;;  %1174 = vmatpush3.bf16.msra.mxu0 %v1277_v15 }
  0x1f   : > { %1181 = vmatprep.mubr.msk.bf16.mxu0 %vm1316_vm0, %v1315_v1  ;;  %1175 = vmatprep.subr.bf16.mxu0 %v1315_v1 }
  0x22   : > { %1176 = vmatpush3.bf16.msra.mxu0 %v1278_v16 }
  0x23   : > { %1177 = vmatprep.subr.bf16.mxu0 %v1315_v1 }
  0x26   : > { %1178 = vmatpush3.bf16.msra.mxu0 %v1279_v17 }
  0x27   : > { %1179 = vmatprep.subr.bf16.mxu0 %v1315_v1 }
  0x2a   : > { %1180 = vmatpush3.bf16.msra.mxu0 %v1280_v18 }
  0x2b   : > { %1205 = vmatprep.subr.bf16.mxu0 %v1315_v1 }
  0x2d   : > { %1182 = vmatmul.mubr.msk.bf16.vlgmr.msra.gmra.mxu0 %vm287_vm1, %v1276_v14 }
  0x2e   : > { %1221 = vmatprep.mubr.msk.bf16.mxu0 %vm1316_vm0, %v1315_v1 }
  0xdd   : > { %v400_v19 = vpop.f32.mrf.mxu1  ;;  %v325_v21 = vpop.f32.mrf.mxu0 }
  0xde   : > { %v484_v27 = vrot.slane %v400_v19, 7  ;;  %v1281_v19 = vld [vmem:[%s1609_s3 + $0x38] sm:$0xff]  }
  0xdf   : > { %v1171_v20 = vpop.f32.mrf.mxu1  ;;  %v1438_v24 = vpop.f32.mrf.mxu0  ;;  %1186 = vmatpush3.bf16.msra.mxu1 %v1281_v19 }
  0xe0   : > { %v489_v31 = vsel %vm483_vm2, 0.0, %v484_v27  ;;  %v1282_v20 = vld [vmem:[%s1609_s3 + $0xb8] sm:$0xff]   ;;  %1187 = vmatprep.subr.bf16.mxu1 %v1315_v1 }
  0xe1   : > { %v403_v22 = vpop.f32.mrf.mxu1  ;;  %v329_v25 = vpop.f32.mrf.mxu0  ;;  %v490_v36 = vadd.f32 %v489_v31, %v325_v21  ;;  %1206 = vmatpush3.bf16.msra.mxu0 %v1282_v20  ;;  %v1283_v21 = vld [vmem:[%s1609_s3 + $0x30] sm:$0xff]   ;;  %v1289_v31 = vld [vmem:[%s1609_s3 + $0x18] sm:$0xff]  }
  0xe2   : > { %v485_v28 = vrot.slane %v403_v22, 7  ;;  %1207 = vmatprep.subr.bf16.mxu0 %v1315_v1  ;;  %v1284_v22 = vld [vmem:[%s1609_s3 + $0xb0] sm:$0xff]  }
  0xe3   : > { %v1172_v23 = vpop.f32.mrf.mxu1  ;;  %v1440_v26 = vpop.f32.mrf.mxu0  ;;  %1188 = vmatpush3.bf16.msra.mxu1 %v1283_v21 }
  0xe4   : > { %v486_v32 = vsel %vm483_vm2, %v484_v27, %v485_v28  ;;  %1189 = vmatprep.subr.bf16.mxu1 %v1315_v1  ;;  %v1285_v23 = vld [vmem:[%s1609_s3 + $0x28] sm:$0xff]  }
  0xe5   : > { %v491_v37 = vadd.f32 %v486_v32, %v329_v25  ;;  %1208 = vmatpush3.bf16.msra.mxu0 %v1284_v22  ;;  %v1286_v25 = vld [vmem:[%s1609_s3 + $0xa8] sm:$0xff]   ;;  %v1290_v32 = vld [vmem:[%s1609_s3 + $0x98] sm:$0xff]  }
  0xe6   : > { %1209 = vmatprep.subr.bf16.mxu0 %v1315_v1 }
  0xe7   : > { %1190 = vmatpush3.bf16.msra.mxu1 %v1285_v23 }
  0xe8   : > { %1191 = vmatprep.subr.bf16.mxu1 %v1315_v1 }
  0xe9   : > { %1210 = vmatpush3.bf16.msra.mxu0 %v1286_v25 }
  0xea   : > { %1211 = vmatprep.subr.bf16.mxu0 %v1315_v1 }
  0xed   : > { %v474_v29 = vpop.f32.mrf.mxu0 }
  0xee   : > { %v495_v34 = vrot.slane %v474_v29, 1  ;;  %v1287_v29 = vld [vmem:[%s1609_s3 + $0x20] sm:$0xff]  }
  0xef   : > { %v1183_v30 = vpop.f32.mrf.mxu0  ;;  %1192 = vmatpush3.bf16.msra.mxu1 %v1287_v29 }
  0xf0   : > { %v1288_v30 = vld [vmem:[%s1609_s3 + $0xa0] sm:$0xff]   ;;  %1193 = vmatprep.subr.bf16.mxu1 %v1315_v1 }
  0xf1   : > { %v477_v33 = vpop.f32.mrf.mxu0  ;;  %1212 = vmatpush3.bf16.msra.mxu0 %v1288_v30 }
  0xf2   : > { %v496_v35 = vrot.slane %v477_v33, 1  ;;  %1213 = vmatprep.subr.bf16.mxu0 %v1315_v1  ;;  %v1291_v33 = vld [vmem:[%s1609_s3 + $0x10] sm:$0xff]  }
  0xf3   : > { %v1184_v38 = vpop.f32.mrf.mxu0  ;;  %1194 = vmatpush3.bf16.msra.mxu1 %v1289_v31 }
  0xf4   : > { %v497_v40 = vsel %vm494_vm3, %v495_v34, %v496_v35  ;;  %v500_v41 = vsel %vm494_vm3, %v496_v35, 0.0  ;;  %1195 = vmatprep.subr.bf16.mxu1 %v1315_v1  ;;  %v1292_v34 = vld [vmem:[%s1609_s3 + $0x90] sm:$0xff]   ;;  %v1293_v35 = vld [vmem:[%s1609_s3 + $0x8] sm:$0xff]   ;;  %v1296_v38 = vld [vmem:[%s1609_s3 + $0x80] sm:$0xff]  }
  0xf5   : > { %v501_v42 = vadd.f32 %v497_v40, %v490_v36  ;;  %v502_v43 = vadd.f32 %v500_v41, %v491_v37  ;;  %1214 = vmatpush3.bf16.msra.mxu0 %v1290_v32  ;;  %v1294_v36 = vld [vmem:[%s1609_s3 + $0x88] sm:$0xff]   ;;  %v1295_v37 = vld [vmem:[%s1609_s3] sm:$0xff]  }
  0xf6   : > { %1215 = vmatprep.subr.bf16.mxu0 %v1315_v1 }
  0xf7   : > { %v1449_v44 = vadd.f32 %v1050_v39, %v501_v42  ;;  %v1451_v45 = vadd.f32 %v1050_v39, %v502_v43  ;;  %1196 = vmatpush3.bf16.msra.mxu1 %v1291_v33  ;;  %v231_v43 = vld [vmem:[%s1610_s4 + $0x5] sm:$0x1] }
  0xf8   : > { %1197 = vmatprep.subr.bf16.mxu1 %v1315_v1  ;;  %vm583_vm4 = vcmp.gt.f32.partialorder %v231_v43, 0.5 }
  0xf9   : > { %v515_v46 = vadd.f32 %v1451_v45, %v1449_v44  ;;  %1216 = vmatpush3.bf16.msra.mxu0 %v1292_v34 }
  0xfa   : > { %1217 = vmatprep.subr.bf16.mxu0 %v1315_v1 }
  0xfb   : > { %v516_v47 = vrot.slane %v515_v46, 4  ;;  %1198 = vmatpush3.bf16.msra.mxu1 %v1293_v35 }
  0xfc   : > { %1199 = vmatprep.subr.bf16.mxu1 %v1315_v1 }
  0xfd   : > { %v517_v48 = vadd.f32 %v516_v47, %v515_v46  ;;  %1218 = vmatpush3.bf16.msra.mxu0 %v1294_v36  ;;  %v584_v46 = vsel %vm583_vm4, 1, %v1317_v4  ;;  %v1051_v36 = vld [vmem:[%s1610_s4 + $0x1] ss:$0 sm:$0xff] }
  0xfe   : > { %1219 = vmatprep.subr.bf16.mxu0 %v1315_v1 }
  0xff   : > { %v518_v49 = vrot.slane %v517_v48, 2  ;;  %1200 = vmatpush3.bf16.msra.mxu1 %v1295_v37 }
 0x100   : > { %1225 = vmatprep.subr.bf16.mxu1 %v1315_v1 }
 0x101   : > { %v519_v50 = vadd.f32 %v518_v49, %v517_v48  ;;  %1220 = vmatpush3.bf16.msra.mxu0 %v1296_v38  ;;  %v588_v49 = vrot.slane %v584_v46, %v1458_v62 }
 0x103   : > { %v520_v51 = vrot.slane %v519_v50, 1  ;;  %vm589_vm5 = vcmp.eq.s32.totalorder %v588_v49, 1 }
 0x105   : > { %v521_v52 = vadd.f32 %v520_v51, %v519_v50  ;;  %v1052_v50 = vld [vmem:[%s1610_s4 + $0x3] ss:$0 sm:$0xff] }
 0x107   : > { %522 = vrot.lane.b32.xlu0 %v521_v52, %s1318_s11 }
 0x179   : > { %v523_v53 = vpop.permute.xlu0 %522 }
 0x17a   : > { %v524_v54 = vadd.f32 %v523_v53, %v521_v52  ;;  %v1053_v53 = vld [vmem:[%s1610_s4 + $0x4] ss:$0 sm:$0xff] }
 0x17c   : > { %525 = vrot.lane.b32.xlu0 %v524_v54, %s1319_s12 }
 0x1ee   : > { %v526_v55 = vpop.permute.xlu0 %525 }
 0x1ef   : > { %v527_v56 = vadd.f32 %v526_v55, %v524_v54 }
 0x1f1   : > { %528 = vrot.lane.b32.xlu1 %v527_v56, %s1320_s13 }
 0x263   : > { %v529_v57 = vpop.permute.xlu1 %528 }
 0x264   : > { %v530_v58 = vadd.f32 %v529_v57, %v527_v56 }
 0x266   : > { %531 = vrot.lane.b32.xlu1 %v530_v58, %s1321_s14 }
 0x2d8   : > { %v532_v61 = vpop.permute.xlu1 %531 }
 0x2d9   : > { %v533_v63 = vadd.f32 %v532_v61, %v530_v58 }
 0x2db   : > { %v534_v0 = vmul.f32 0.00390625, %v533_v63  ;;  %v1297_v63 = vld [vmem:[%s1609_s3 + $0x78] sm:$0xff]  }
 0x2dd   : > { %v538_v2 = vrot.slane %v534_v0, %v1458_v62 }
 0x2df   : > { %v1462_v3 = vsub.f32 %v1449_v44, %v538_v2  ;;  %v1465_v5 = vsub.f32 %v1451_v45, %v538_v2  ;;  %v1300_v2 = vld [vmem:[%s1609_s3 + $0x60] sm:$0xff]  }
 0x2e1   : > { %v541_v6 = vmul.f32 %v1462_v3, %v1462_v3  ;;  %v542_v7 = vmul.f32 %v1465_v5, %v1465_v5 }
 0x2e3   : > { %v543_v8 = vadd.f32 %v542_v7, %v541_v6  ;;  %v1303_v6 = vld [vmem:[%s1609_s3 + $0x48] sm:$0xff]   ;;  %v1304_v7 = vld [vmem:[%s1609_s3 + $0x40] sm:$0xff]  }
 0x2e5   : > { %v544_v9 = vrot.slane %v543_v8, 4 }
 0x2e7   : > { %v545_v10 = vadd.f32 %v544_v9, %v543_v8 }
 0x2e9   : > { %v546_v11 = vrot.slane %v545_v10, 2 }
 0x2eb   : > { %v547_v12 = vadd.f32 %v546_v11, %v545_v10 }
 0x2ed   : > { %v548_v13 = vrot.slane %v547_v12, 1 }
 0x2ef   : > { %v549_v14 = vadd.f32 %v548_v13, %v547_v12 }
 0x2f1   : > { %550 = vrot.lane.b32.xlu0 %v549_v14, %s1318_s11 }
 0x363   : > { %v551_v15 = vpop.permute.xlu0 %550 }
 0x364   : > { %v552_v16 = vadd.f32 %v551_v15, %v549_v14 }
 0x366   : > { %553 = vrot.lane.b32.xlu1 %v552_v16, %s1319_s12 }
 0x3d8   : > { %v554_v17 = vpop.permute.xlu1 %553 }
 0x3d9   : > { %v555_v18 = vadd.f32 %v554_v17, %v552_v16  ;;  %v1102_v17 = vld [vmem:[%s1610_s4 + $0x2] ss:$0 sm:$0xff] }
 0x3db   : > { %556 = vrot.lane.b32.xlu0 %v555_v18, %s1320_s13 }
 0x44d   : > { %v557_v27 = vpop.permute.xlu0 %556 }
 0x44e   : > { %v558_v28 = vadd.f32 %v557_v27, %v555_v18 }
 0x450   : > { %559 = vrot.lane.b32.xlu1 %v558_v28, %s1321_s14 }
 0x4c2   : > { %v560_v39 = vpop.permute.xlu1 %559 }
 0x4c3   : > { %v561_v40 = vadd.f32 %v560_v39, %v558_v28 }
 0x4c5   : > { %v562_v41 = vmul.f32 0.00390625, %v561_v40  ;;  %v513_v40 = vadd.f32 %v1051_v36, %v1438_v24 }
 0x4c7   : > { %v563_v42 = vadd.f32 1e-05, %v562_v41  ;;  %v514_v41 = vadd.f32 %v1051_v36, %v1440_v26 }
 0x4c9   : > { %1305 = vrsqrt.f32 %v563_v42 }
 0x4d6   : > { %v1306_v47 = vpop.eup %1305 }
 0x4d7   : > { %v568_v48 = vrot.slane %v1306_v47, %v1458_v62 }
 0x4d9   : > { %v569_v51 = vmul.f32 %v568_v48, %v1462_v3  ;;  %v570_v52 = vmul.f32 %v568_v48, %v1465_v5  ;;  %v1301_v3 = vld [vmem:[%s1609_s3 + $0x58] sm:$0xff]   ;;  %v1302_v5 = vld [vmem:[%s1609_s3 + $0x50] sm:$0xff]  }
 0x4db   : > { %v575_v54 = vmul.f32 %v1052_v50, %v569_v51  ;;  %v576_v55 = vmul.f32 %v1052_v50, %v570_v52 }
 0x4dd   : > { %v581_v4 = vadd.f32 %v1053_v53, %v575_v54  ;;  %v582_v56 = vadd.f32 %v1053_v53, %v576_v55 }
 0x4df   : > { %v590_v57 = vsel %vm589_vm5, %v581_v4, %v1449_v44  ;;  %v591_v58 = vsel %vm589_vm5, %v582_v56, %v1451_v45  ;;  %v1298_v44 = vld [vmem:[%s1609_s3 + $0x70] sm:$0xff]   ;;  %v1299_v45 = vld [vmem:[%s1609_s3 + $0x68] sm:$0xff]  }
 0x4e0   : > { %vm592_vm6 = vcmp.gt.f32.partialorder %v590_v57, 0.0  ;;  %vm593_vm7 = vcmp.gt.f32.partialorder %v591_v58, 0.0  ;;  %v594_v59 = vmul.f32 0.1, %v590_v57  ;;  %v595_v60 = vmul.f32 0.1, %v591_v58 }
 0x4e2   : > { %v596_v61 = vsel %vm592_vm6, %v590_v57, %v594_v59  ;;  %v597_v62 = vsel %vm593_vm7, %v591_v58, %v595_v60 }
 0x4e3   : > { %v598_v0 = vpack.c.bf16 %v597_v62, %v596_v61 }
 0x4e5   : > { %1202 = vmatmul.mubr.bf16.vlgmr.msra.gmra.mxu1 %v598_v0  ;;  %1222 = vmatmul.mubr.bf16.vlgmr.msra.gmra.mxu0 %v598_v0 }
 0x4e6   : > { %1226 = vmatpush3.bf16.msra.mxu1 %v1297_v63  ;;  %1241 = vmatprep.mubr.msk.bf16.mxu1 %vm1316_vm0, %v1315_v1 }
 0x4e7   : > { %1227 = vmatprep.subr.bf16.mxu1 %v1315_v1 }
 0x4ea   : > { %1228 = vmatpush3.bf16.msra.mxu1 %v1298_v44 }
 0x4eb   : > { %1229 = vmatprep.subr.bf16.mxu1 %v1315_v1 }
 0x4ee   : > { %1230 = vmatpush3.bf16.msra.mxu1 %v1299_v45 }
 0x4ef   : > { %1231 = vmatprep.subr.bf16.mxu1 %v1315_v1 }
 0x4f2   : > { %1232 = vmatpush3.bf16.msra.mxu1 %v1300_v2 }
 0x4f3   : > { %1233 = vmatprep.subr.bf16.mxu1 %v1315_v1 }
 0x4f6   : > { %1234 = vmatpush3.bf16.msra.mxu1 %v1301_v3 }
 0x4f7   : > { %1235 = vmatprep.subr.bf16.mxu1 %v1315_v1 }
 0x4fa   : > { %1236 = vmatpush3.bf16.msra.mxu1 %v1302_v5 }
 0x4fb   : > { %1237 = vmatprep.subr.bf16.mxu1 %v1315_v1 }
 0x4fe   : > { %1238 = vmatpush3.bf16.msra.mxu1 %v1303_v6 }
 0x4ff   : > { %1239 = vmatprep.subr.bf16.mxu1 %v1315_v1 }
 0x502   : > { %1240 = vmatpush3.bf16.msra.mxu1 %v1304_v7 }
 0x505   : > { %1242 = vmatmul.mubr.bf16.vlgmr.msra.gmra.mxu1 %v598_v0 }
 0x5a5   : > { %v697_v8 = vpop.f32.mrf.mxu1  ;;  %v820_v9 = vpop.f32.mrf.mxu0 }
 0x5a6   : > { %v922_v16 = vrot.slane %v697_v8, 7  ;;  %v932_v21 = vrot.slane %v820_v9, 1 }
 0x5a7   : > { %v1203_v10 = vpop.f32.mrf.mxu1  ;;  %v1223_v11 = vpop.f32.mrf.mxu0 }
 0x5a8   : > { %v927_v1 = vsel %vm483_vm2, 0.0, %v922_v16 }
 0x5a9   : > { %v700_v12 = vpop.f32.mrf.mxu1  ;;  %v823_v13 = vpop.f32.mrf.mxu0 }
 0x5aa   : > { %v933_v18 = vrot.slane %v823_v13, 1  ;;  %v923_v22 = vrot.slane %v700_v12, 7 }
 0x5ab   : > { %v1204_v14 = vpop.f32.mrf.mxu1  ;;  %v1224_v15 = vpop.f32.mrf.mxu0 }
 0x5ac   : > { %v934_v27 = vsel %vm494_vm3, %v932_v21, %v933_v18  ;;  %v924_v31 = vsel %vm483_vm2, %v922_v16, %v923_v22  ;;  %v937_v35 = vsel %vm494_vm3, %v933_v18, 0.0 }
 0x5c5   : > { %v913_v19 = vpop.f32.mrf.mxu1 }
 0x5c6   : > { %v914_v20 = vadd.f32 %v1102_v17, %v913_v19 }
 0x5c7   : > { %v1243_v23 = vpop.f32.mrf.mxu1 }
 0x5c8   : > { %v928_v25 = vadd.f32 %v927_v1, %v914_v20 }
 0x5c9   : > { %v916_v28 = vpop.f32.mrf.mxu1 }
 0x5ca   : > { %v938_v29 = vadd.f32 %v934_v27, %v928_v25  ;;  %v917_v30 = vadd.f32 %v1102_v17, %v916_v28 }
 0x5cb   : > { %v1244_v32 = vpop.f32.mrf.mxu1 }
 0x5cc   : > { %v942_v33 = vmul.f32 0.1, %v938_v29  ;;  %v929_v34 = vadd.f32 %v924_v31, %v917_v30  ;;  %vm940_vm8 = vcmp.gt.f32.partialorder %v938_v29, 0.0 }
 0x5ce   : > { %v939_v37 = vadd.f32 %v937_v35, %v929_v34  ;;  %v944_v38 = vsel %vm940_vm8, %v938_v29, %v942_v33 }
 0x5cf   : > { %v946_v43 = vadd.f32 %v944_v38, %v513_v40 }
 0x5d0   : > { %vm941_vm9 = vcmp.gt.f32.partialorder %v939_v37, 0.0  ;;  %v943_v39 = vmul.f32 0.1, %v939_v37 }
 0x5d2   : > { %v945_v42 = vsel %vm941_vm9, %v939_v37, %v943_v39 }
 0x5d3   : > { %v947_v46 = vadd.f32 %v945_v42, %v514_v41 }
 0x5d5   : > { %v1122_v47 = vpack.c.bf16 %v947_v46, %v946_v43 }
 0x5d7   : > { %1123 = vst [vmem:[%s224_s8] sm:$0xff] %v1122_v47  }
 0x5d8 PF: > { %s15_s18 = sadd.s32 1, %s1313_s18  }
 0x5d9   : > { %p12_p4 = scmp.ge.s32.totalorder %s15_s18, 4  }
 0x5db   :  { %14 = sbr.rel (!%p12_p4) target bundleno = 1 (0x1), region = 73 }

</bundles_post_ra>
